<compile_context>
chip_gen: v5e
topology: v5e:2x2
jax: 0.10.0
libtpu: 0.0.40
codegen_flags: <defaults>
</compile_context>

<pallas_src>
import jax
import jax.numpy as jnp
from jax.experimental import pallas as pl
from jax.experimental.pallas import tpu as pltpu


def agent_mlp_kernel(obs_ref, w1_ref, b1_ref, w2_ref, b2_ref, out_ref):
    # obs_ref: (bm, D) bf16   w1_ref: (D, H) bf16   b1_ref: (1, H) f32
    # w2_ref : (H, Ap) bf16   b2_ref: (1, Ap) f32   out_ref: (bm, Ap) f32
    h = jnp.dot(obs_ref[...], w1_ref[...], preferred_element_type=jnp.float32)
    h = jnp.maximum(h + b1_ref[...], 0.0)            # bias + ReLU on VPU (f32)
    logits = jnp.dot(h.astype(jnp.bfloat16), w2_ref[...],
                     preferred_element_type=jnp.float32)
    out_ref[...] = (logits + b2_ref[...]).astype(out_ref.dtype)


def _pad_axis(x, axis, target):
    pad = target - x.shape[axis]
    if pad == 0:
        return x
    widths = [(0, 0)] * x.ndim
    widths[axis] = (0, pad)
    return jnp.pad(x, widths)


def agent_network_forward(obs, w1, b1, w2, b2, *, block_batch=256):
    """Fused 2-layer MLP policy head: relu(obs @ W1 + b1) @ W2 + b2."""
    B, D = obs.shape
    H = w1.shape[1]
    A = w2.shape[1]

    bm = block_batch
    assert bm % 8 == 0, "block_batch must be a multiple of 8 (sublane tiling)"

    # Lane-dense output: pad the action dim up to a multiple of 128.  Padded
    # columns carry zero weights/bias and are sliced off before returning.
    A_pad = pl.cdiv(A, 128) * 128
    # Batch padded to a whole number of tiles (pl.cdiv grid, no divisibility
    # requirement on the caller).
    n_blocks = pl.cdiv(B, bm)
    B_pad = n_blocks * bm

    # bf16 operands for the MXU; biases stay f32, accumulation is f32.
    obs_p = _pad_axis(obs, 0, B_pad).astype(jnp.bfloat16)
    w1_bf = w1.astype(jnp.bfloat16)
    b1_f = jnp.reshape(b1, (1, H)).astype(jnp.float32)
    w2_p = _pad_axis(w2, 1, A_pad).astype(jnp.bfloat16)
    b2_p = _pad_axis(jnp.reshape(b2, (1, A)), 1, A_pad).astype(jnp.float32)

    cost = pl.CostEstimate(
        flops=2 * B_pad * (D * H + H * A_pad),
        transcendentals=0,
        bytes_accessed=(B_pad * D * 2          # obs (bf16)
                        + D * H * 2            # W1 (bf16)
                        + H * 4                # b1 (f32)
                        + H * A_pad * 2        # W2 (bf16)
                        + A_pad * 4            # b2 (f32)
                        + B_pad * A_pad * 4),  # logits out (f32)
    )

    out = pl.pallas_call(
        agent_mlp_kernel,
        out_shape=jax.ShapeDtypeStruct((B_pad, A_pad), jnp.float32),
        grid_spec=pltpu.PrefetchScalarGridSpec(
            num_scalar_prefetch=0,
            grid=(n_blocks,),
            in_specs=[
                pl.BlockSpec((bm, D), lambda i: (i, 0)),      # obs tile / step
                pl.BlockSpec((D, H), lambda i: (0, 0)),       # W1 resident
                pl.BlockSpec((1, H), lambda i: (0, 0)),       # b1
                pl.BlockSpec((H, A_pad), lambda i: (0, 0)),   # W2 resident
                pl.BlockSpec((1, A_pad), lambda i: (0, 0)),   # b2
            ],
            out_specs=pl.BlockSpec((bm, A_pad), lambda i: (i, 0)),
        ),
        compiler_params=pltpu.CompilerParams(
            # Batch axis is independent -> megacore-shardable on v7x.
            dimension_semantics=("parallel",),
            # NOTE: at production hidden sizes on v7x (64 MiB VMEM), shrink bm
            # and/or raise vmem_limit_bytes here; demo shapes fit defaults.
        ),
        cost_estimate=cost,
    )(obs_p, w1_bf, b1_f, w2_p, b2_p)

    # Strip batch/action padding before any softmax/argmax downstream.
    return out[:B, :A]


def init_params(key, obs_dim, hidden, n_actions, dtype=jnp.float32):
    # Deterministic init mimicking nn.Linear default (uniform ±1/sqrt(fan_in)).
    k1, k2, k3, k4 = jax.random.split(key, 4)
    lim1 = 1.0 / jnp.sqrt(obs_dim)
    lim2 = 1.0 / jnp.sqrt(hidden)
    w1 = jax.random.uniform(k1, (obs_dim, hidden), dtype, -lim1, lim1)
    b1 = jax.random.uniform(k2, (1, hidden), dtype, -lim1, lim1)
    w2 = jax.random.uniform(k3, (hidden, n_actions), dtype, -lim2, lim2)
    b2 = jax.random.uniform(k4, (1, n_actions), dtype, -lim2, lim2)
    return w1, b1, w2, b2


if __name__ == "__main__":
    key = jax.random.PRNGKey(0)
    k_obs, k_params = jax.random.split(key)

    # Small demo shapes; B is deliberately not a multiple of the tile to
    # exercise the cdiv/padding path, and block_batch=64 gives a 4-step grid.
    B, OBS_DIM, HIDDEN, N_ACTIONS = 200, 32, 128, 8
    obs = jax.random.normal(k_obs, (B, OBS_DIM), jnp.float32)
    w1, b1, w2, b2 = init_params(k_params, OBS_DIM, HIDDEN, N_ACTIONS)

    out = agent_network_forward(obs, w1, b1, w2, b2, block_batch=64)
    out = jax.block_until_ready(out)

    # Cross-check against a plain-JAX reference with identical bf16 operand
    # rounding (f32 accumulation), matching the kernel's datapath.
    obs_bf = obs.astype(jnp.bfloat16).astype(jnp.float32)
    w1_bf = w1.astype(jnp.bfloat16).astype(jnp.float32)
    w2_bf = w2.astype(jnp.bfloat16).astype(jnp.float32)
    h = jnp.maximum(obs_bf @ w1_bf + b1, 0.0)
    h = h.astype(jnp.bfloat16).astype(jnp.float32)
    ref = h @ w2_bf + b2

    assert out.shape == (B, N_ACTIONS)
    assert jnp.allclose(out, ref, atol=5e-3, rtol=5e-3)

    print("KERNEL_OK")
</pallas_src>

<mosaic_0001>
module attributes {stable_mosaic.version = 11 : i64} {
  func.func @agent_mlp_kernel(%arg0: i32, %arg1: memref<64x32xbf16, #tpu.memory_space<vmem>>, %arg2: memref<32x128xbf16, #tpu.memory_space<vmem>>, %arg3: memref<1x128xf32, #tpu.memory_space<vmem>>, %arg4: memref<128x128xbf16, #tpu.memory_space<vmem>>, %arg5: memref<1x128xf32, #tpu.memory_space<vmem>>, %arg6: memref<64x128xf32, #tpu.memory_space<vmem>>) attributes {dimension_semantics = [#tpu.dimension_semantics<parallel>], iteration_bounds = array<i64: 4>, scalar_prefetch = 0 : i64, scratch_operands = 0 : i64, tpu.core_type = #tpu.core_type<tc>, window_params = [{transform_indices = @transform_0, window_bounds = array<i64: 64, 32>}, {pipeline_mode = #tpu.pipeline_mode<synchronous>, transform_indices = @transform_1, window_bounds = array<i64: 32, 128>}, {pipeline_mode = #tpu.pipeline_mode<synchronous>, transform_indices = @transform_2, window_bounds = array<i64: 1, 128>}, {pipeline_mode = #tpu.pipeline_mode<synchronous>, transform_indices = @transform_3, window_bounds = array<i64: 128, 128>}, {pipeline_mode = #tpu.pipeline_mode<synchronous>, transform_indices = @transform_4, window_bounds = array<i64: 1, 128>}, {transform_indices = @transform_5, window_bounds = array<i64: 64, 128>}]} {
    %c0 = arith.constant 0 : index
    %c0_0 = arith.constant 0 : index
    %0 = vector.load %arg1[%c0, %c0_0] : memref<64x32xbf16, #tpu.memory_space<vmem>>, vector<64x32xbf16>
    %c0_1 = arith.constant 0 : index
    %c0_2 = arith.constant 0 : index
    %1 = vector.load %arg2[%c0_1, %c0_2] : memref<32x128xbf16, #tpu.memory_space<vmem>>, vector<32x128xbf16>
    %cst = arith.constant dense<0.000000e+00> : vector<64x128xf32>
    %2 = tpu.matmul %0, %1, %cst {dimension_numbers = #tpu.dot_dimension_numbers<[1], [0], [0], [1], [0, 0, 1, 1], [], []>} : vector<64x32xbf16>, vector<32x128xbf16>, vector<64x128xf32> -> vector<64x128xf32>
    %c0_3 = arith.constant 0 : index
    %c0_4 = arith.constant 0 : index
    %3 = vector.load %arg3[%c0_3, %c0_4] : memref<1x128xf32, #tpu.memory_space<vmem>>, vector<1x128xf32>
    %4 = vector.broadcast %3 : vector<1x128xf32> to vector<64x128xf32>
    %5 = arith.addf %2, %4 : vector<64x128xf32>
    %cst_5 = arith.constant 0.000000e+00 : f32
    %6 = vector.broadcast %cst_5 : f32 to vector<64x128xf32>
    %7 = arith.maximumf %5, %6 : vector<64x128xf32>
    %8 = arith.truncf %7 : vector<64x128xf32> to vector<64x128xbf16>
    %c0_6 = arith.constant 0 : index
    %c0_7 = arith.constant 0 : index
    %9 = vector.load %arg4[%c0_6, %c0_7] : memref<128x128xbf16, #tpu.memory_space<vmem>>, vector<128x128xbf16>
    %cst_8 = arith.constant dense<0.000000e+00> : vector<64x128xf32>
    %10 = tpu.matmul %8, %9, %cst_8 {dimension_numbers = #tpu.dot_dimension_numbers<[1], [0], [0], [1], [0, 0, 1, 1], [], []>} : vector<64x128xbf16>, vector<128x128xbf16>, vector<64x128xf32> -> vector<64x128xf32>
    %c0_9 = arith.constant 0 : index
    %c0_10 = arith.constant 0 : index
    %11 = vector.load %arg5[%c0_9, %c0_10] : memref<1x128xf32, #tpu.memory_space<vmem>>, vector<1x128xf32>
    %12 = vector.broadcast %11 : vector<1x128xf32> to vector<64x128xf32>
    %13 = arith.addf %10, %12 : vector<64x128xf32>
    %c0_11 = arith.constant 0 : index
    %c0_12 = arith.constant 0 : index
    %14 = vector.load %arg6[%c0_11, %c0_12] : memref<64x128xf32, #tpu.memory_space<vmem>>, vector<64x128xf32>
    tpu.vector_store %arg6[%c0_11, %c0_12], %13 {strides = array<i32>} : memref<64x128xf32, #tpu.memory_space<vmem>>, vector<64x128xf32>,
    return
  }
  func.func @transform_0(%arg0: i32) -> (i32, i32) {
    %c0_i32 = arith.constant 0 : i32
    %c0_i32_0 = arith.constant 0 : i32
    return %arg0, %c0_i32 : i32, i32
  }
  func.func @transform_1(%arg0: i32) -> (i32, i32) {
    %c0_i32 = arith.constant 0 : i32
    %c0_i32_0 = arith.constant 0 : i32
    %c0_i32_1 = arith.constant 0 : i32
    return %c0_i32, %c0_i32_0 : i32, i32
  }
  func.func @transform_2(%arg0: i32) -> (i32, i32) {
    %c0_i32 = arith.constant 0 : i32
    %c0_i32_0 = arith.constant 0 : i32
    %c0_i32_1 = arith.constant 0 : i32
    return %c0_i32, %c0_i32_0 : i32, i32
  }
  func.func @transform_3(%arg0: i32) -> (i32, i32) {
    %c0_i32 = arith.constant 0 : i32
    %c0_i32_0 = arith.constant 0 : i32
    %c0_i32_1 = arith.constant 0 : i32
    return %c0_i32, %c0_i32_0 : i32, i32
  }
  func.func @transform_4(%arg0: i32) -> (i32, i32) {
    %c0_i32 = arith.constant 0 : i32
    %c0_i32_0 = arith.constant 0 : i32
    %c0_i32_1 = arith.constant 0 : i32
    return %c0_i32, %c0_i32_0 : i32, i32
  }
  func.func @transform_5(%arg0: i32) -> (i32, i32) {
    %c0_i32 = arith.constant 0 : i32
    %c0_i32_0 = arith.constant 0 : i32
    return %arg0, %c0_i32 : i32, i32
  }
}

</mosaic_0001>

<bundles_post_ra>
// kernel: tpu_custom_call.1
= control target key start
LH: loop header
LB: loop body
LE: loop exit
PB: predicated region body
PF: predicated region fallthrough
CT: control target
= control target key end

     0   :  { %10 = vsyncpa [#allocation3], 0  ;;  %s884_s0 = inlined_call_operand.vmem [shape: bf16[256,32], index: 0, kind: input, shape index: {}]   ;;  %s885_s1 = inlined_call_operand.vmem [shape: bf16[32,128], index: 1, kind: input, shape index: {}]   ;;  %s886_s2 = inlined_call_operand.vmem [shape: f32[1,128], index: 2, kind: input, shape index: {}]   ;;  %s887_s3 = inlined_call_operand.vmem [shape: bf16[128,128], index: 3, kind: input, shape index: {}]   ;;  %s888_s4 = inlined_call_operand.vmem [shape: f32[1,128], index: 4, kind: input, shape index: {}]   ;;  %s889_s5 = inlined_call_operand.hbm [shape: f32[256,128], index: 5, kind: output, shape index: {}]  }
   0x1   :  { %12 = vsyncpa [#allocation3 + $0x1], 0  ;;  %s756_s18 = smov 0   ;;  %s758_s19 = smov 0  }
   0x2   :  { %s760_s20 = smov 0   ;;  %s762_s21 = smov 0  }
   0x3 LB: > { %s777_s22 = sadd.s32 4294967295, %s722_s21   ;;  %s512_s23 = sadd.s32 4294967294, %s722_s21   ;;  %s722_s21 = sphi %s762_s21, %s895_s21   ;;  %s718_s20 = sphi %s760_s20, %s894_s20   ;;  %s714_s19 = sphi %s758_s19, %s893_s19   ;;  %s710_s18 = sphi %s756_s18, %s892_s18  }
   0x4   : > { %s781_s24 = sadd.s32 1, %s722_s21   ;;  %s135_s25 = sadd.s32 1, %s718_s20 }
   0x5   : > { %s132_s26 = ssub.s32 %s722_s21, %s781_s24  ;;  %p145_p0 = scmp.ne.s32.totalorder %s718_s20, %s714_s19 }
   0x6   : > { %p133_p1 = scmp.eq.s32.totalorder %s132_s26, 0  ;;  %p146_p2 = scmp.eq.s32.totalorder %s777_s22, 3 }
   0x7   : > { %p151_p3 = scmp.ne.s32.totalorder %s714_s19, %s710_s18  ;;  %p152_p4 = scmp.eq.s32.totalorder %s512_s23, 3 }
   0x8   : > { %s792_s27 = scalar_select %p133_p1, %s718_s20, %s135_s25  }
   0x9   : > { %p794_p5 = por %p146_p2, %p145_p0  ;;  %p798_p6 = por %p152_p4, %p151_p3 }
   0xa   : > { %p515_p7 = scmp.ge.s32.totalorder %s722_s21, 1  ;;  %p191_p8 = scmp.lt.s32.totalorder %s722_s21, 5 }
   0xc   : > { %p192_p9 = pnand %p515_p7, %p191_p8 }
   0xd   : > { %s517_s7 = sshll.u32 (!%p192_p9), %s777_s22, 3  ;;  %s216_s16 = sand.u32 (!%p192_p9), 1, %s714_s19  }
   0xe   : > { %195 = sbr.rel (%p192_p9) target bundleno = 351 (0x15f), region = 40  ;;  %p220_p10 = scmp.lt.s32.totalorder (!%p192_p9), %s517_s7, 31 }
   0xf   : > { %s516_s17 = sshll.u32 (!%p192_p9), %s216_s16, 6  ;;  %s598_s30 = sshll.u32 (!%p192_p9), %s777_s22, 6 }
  0x10   : > { %s218_s26 = scalar_lea.vmem (!%p192_p9), [#allocation2], %s516_s17  ;;  %s446_s8 = scalar_lea.hbm (!%p192_p9), %s889_s5, %s598_s30 }
  0x11   : > { %s447_s9 = sshll.u32 (!%p192_p9), %s218_s26, 4  ;;  %s435_s11 = scalar_lea.sflag (!%p192_p9), [#allocation3], %s216_s16  ;;  %s448_s9 = int_to_ptr.vmem [resolvable:$true] %s447_s9 }
  0x12   : > { %s680_s15 = scalar_lea.hbm (!%p192_p9), %s889_s5, 256 }
  0x13   : > { %v589_v0 = vld [vmem:[%s885_s1 + $0x8] sm:$0xff]  ;;  %v588_v1 = vld [vmem:[%s885_s1] sm:$0xff]  ;;  %s897_s7 = smov (!%p220_p10, %s517_s7), 31  ;;  %vm275_vm0 = vcmask 261120   ;;  %v597_v4 = vld [vmem:[%s887_s3 + $0x38] sm:$0xff] }
  0x14   : > { %599 = vmatpush.bf16.msra.mxu3 %v589_v0  ;;  %294 = vmatpush.bf16.msra.mxu0 %v589_v0  ;;  %s518_s10 = sshll.u32 %s897_s7, 2  ;;  %v596_v5 = vld [vmem:[%s887_s3 + $0x30] sm:$0xff]  ;;  %v595_v6 = vld [vmem:[%s887_s3 + $0x28] sm:$0xff]  ;;  %v594_v7 = vld [vmem:[%s887_s3 + $0x20] sm:$0xff] }
  0x15   : > { %s223_s13 = scalar_lea.vmem %s884_s0, %s518_s10  ;;  %601 = vmatpush.bf16.msra.mxu1 %v597_v4  ;;  %602 = vmatpush.bf16.msra.mxu2 %v597_v4  ;;  %v593_v10 = vld [vmem:[%s887_s3 + $0x18] sm:$0xff]  ;;  %v592_v11 = vld [vmem:[%s887_s3 + $0x10] sm:$0xff]  ;;  %v591_v12 = vld [vmem:[%s887_s3 + $0x8] sm:$0xff]  ;;  %s449_s10 = sshll.u32 %s446_s8, 4  ;;  %s450_s10 = int_to_ptr.hbm [resolvable:$true] %s449_s10 }
  0x16   : > { %v585_v2 = vld [vmem:[%s223_s13 + $0x8] sm:$0xff]  ;;  %v584_v3 = vld [vmem:[%s223_s13] sm:$0xff]  ;;  %v586_v8 = vld [vmem:[%s223_s13 + $0x10] sm:$0xff]  ;;  %s674_s12 = sshra.s32 %s450_s10, 4  ;;  %s675_s12 = int_to_ptr.hbm [resolvable:$true] %s674_s12 }
  0x17   : > { %v587_v9 = vld [vmem:[%s223_s13 + $0x18] sm:$0xff]  ;;  %v590_v13 = vld [vmem:[%s887_s3] sm:$0xff]  ;;  %s676_s22 = scalar_lea.hbm %s675_s12, 64  ;;  %p681_p0 = scmp.lt.s32.totalorder %s675_s12, %s889_s5 }
  0x18   : > { %600 = vmatpush.bf16.msra.mxu3 %v588_v1  ;;  %295 = vmatpush.bf16.msra.mxu0 %v588_v1  ;;  %v658_v15 = vld [vmem:[%s886_s2] ss:$0 sm:$0xff]  ;;  %p677_p11 = scmp.ne.s32.totalorder %s675_s12, %s676_s22  ;;  %p682_p1 = scmp.lt.s32.totalorder %s680_s15, %s676_s22 }
  0x19   : > { %603 = vmatpush.bf16.msra.mxu1 %v596_v5  ;;  %604 = vmatpush.bf16.msra.mxu2 %v596_v5  ;;  %v659_v43 = vld [vmem:[%s888_s4] ss:$0 sm:$0xff] }
  0x1a   : > { %p678_p12 = pnand %p677_p11, %p794_p5  ;;  %p683_p2 = por %p682_p1, %p681_p0 }
  0x1b   : > { %544 = vmatmul.msk.bf16.vlgmr.msra.gmra.mxu3 %vm275_vm0, %v585_v2  ;;  %543 = vmatmul.msk.bf16.vlgmr.msra.gmra.mxu0 %vm275_vm0, %v584_v3 }
  0x1c   : > { %397 = vmatpush.bf16.msrb.mxu0 %v597_v4  ;;  %p679_p13 = pneg %p678_p12 }
  0x1d   : > { %605 = vmatpush.bf16.msra.mxu1 %v595_v6  ;;  %606 = vmatpush.bf16.msra.mxu2 %v595_v6 }
  0x1e   : > { %p684_p3 = pnand %p683_p2, %p679_p13 }
  0x20   : > { %398 = vmatpush.bf16.msrb.mxu0 %v596_v5 }
  0x21   : > { %607 = vmatpush.bf16.msra.mxu1 %v594_v7  ;;  %608 = vmatpush.bf16.msra.mxu2 %v594_v7 }
  0x24   : > { %399 = vmatpush.bf16.msrb.mxu0 %v595_v6 }
  0x25   : > { %609 = vmatpush.bf16.msra.mxu1 %v593_v10  ;;  %610 = vmatpush.bf16.msra.mxu2 %v593_v10 }
  0x28   : > { %400 = vmatpush.bf16.msrb.mxu0 %v594_v7 }
  0x29   : > { %611 = vmatpush.bf16.msra.mxu1 %v592_v11  ;;  %612 = vmatpush.bf16.msra.mxu2 %v592_v11 }
  0x2b   : > { %545 = vmatmul.msk.bf16.gmra.mxu3 %vm275_vm0, %v586_v8 }
  0x2c   : > { %401 = vmatpush.bf16.msrb.mxu0 %v593_v10 }
  0x2d   : > { %613 = vmatpush.bf16.msra.mxu1 %v591_v12  ;;  %614 = vmatpush.bf16.msra.mxu2 %v591_v12 }
  0x30   : > { %402 = vmatpush.bf16.msrb.mxu0 %v592_v11 }
  0x31   : > { %615 = vmatpush.bf16.msra.mxu1 %v590_v13  ;;  %616 = vmatpush.bf16.msra.mxu2 %v590_v13 }
  0x34   : > { %403 = vmatpush.bf16.msrb.mxu0 %v591_v12 }
  0x38   : > { %404 = vmatpush.bf16.msrb.mxu0 %v590_v13 }
  0x3b   : > { %546 = vmatmul.msk.bf16.gmra.mxu3 %vm275_vm0, %v587_v9 }
  0x98   : > { %v297_v14 = vpop.f32.mrf.mxu0 }
  0x99   : > { %v298_v16 = vadd.f32 %v658_v15, %v297_v14 }
  0x9b   : > { %v317_v19 = vmax.f32 %v298_v16, 0.0 }
  0x9e   : > { %v302_v17 = vpop.f32.mrf.mxu3 }
  0x9f   : > { %v303_v22 = vadd.f32 %v658_v15, %v302_v17 }
  0xa0   : > { %v299_v18 = vpop.f32.mrf.mxu0 }
  0xa1   : > { %v300_v20 = vadd.f32 %v658_v15, %v299_v18  ;;  %v319_v26 = vmax.f32 %v303_v22, 0.0 }
  0xa3   : > { %v318_v21 = vmax.f32 %v300_v20, 0.0 }
  0xa5   : > { %v325_v23 = vpack.c.bf16 %v318_v21, %v317_v19 }
  0xa6   : > { %v304_v24 = vpop.f32.mrf.mxu3 }
  0xa7   : > { %v305_v25 = vadd.f32 %v658_v15, %v304_v24  ;;  %405 = vmatmul.bf16.vlgmr.msrb.gmra.mxu0 %v325_v23 }
  0xa9   : > { %v320_v27 = vmax.f32 %v305_v25, 0.0 }
  0xab   : > { %v326_v28 = vpack.c.bf16 %v320_v27, %v319_v26 }
  0xad   : > { %410 = vmatmul.bf16.vlgmr.msra.gmra.mxu1 %v326_v28 }
  0xae   : > { %v307_v29 = vpop.f32.mrf.mxu3 }
  0xaf   : > { %v308_v30 = vadd.f32 %v658_v15, %v307_v29 }
  0xb1   : > { %v321_v33 = vmax.f32 %v308_v30, 0.0 }
  0xb6   : > { %v309_v31 = vpop.f32.mrf.mxu3 }
  0xb7   : > { %v310_v32 = vadd.f32 %v658_v15, %v309_v31 }
  0xb9   : > { %v322_v34 = vmax.f32 %v310_v32, 0.0 }
  0xbb   : > { %v327_v35 = vpack.c.bf16 %v322_v34, %v321_v33 }
  0xbd   : > { %415 = vmatmul.bf16.vlgmr.msra.gmra.mxu2 %v327_v35 }
  0xbe   : > { %v312_v36 = vpop.f32.mrf.mxu3 }
  0xbf   : > { %v313_v37 = vadd.f32 %v658_v15, %v312_v36 }
  0xc1   : > { %v323_v40 = vmax.f32 %v313_v37, 0.0 }
  0xc6   : > { %v314_v38 = vpop.f32.mrf.mxu3 }
  0xc7   : > { %v315_v39 = vadd.f32 %v658_v15, %v314_v38 }
  0xc9   : > { %v324_v41 = vmax.f32 %v315_v39, 0.0 }
  0xcb   : > { %v328_v42 = vpack.c.bf16 %v324_v41, %v323_v40 }
  0xcd   : > { %420 = vmatmul.bf16.gmra.mxu2 %v328_v42 }
 0x124   : > { %v406_v44 = vpop.f32.mrf.mxu0 }
 0x125   : > { %v407_v45 = vadd.f32 %v659_v43, %v406_v44 }
 0x127   : > { %426 = vst [vmem:[%s218_s26] sm:$0xff] %v407_v45 }
 0x12a   : > { %v411_v46 = vpop.f32.mrf.mxu1 }
 0x12b   : > { %v412_v47 = vadd.f32 %v659_v43, %v411_v46 }
 0x12c   : > { %v408_v48 = vpop.f32.mrf.mxu0 }
 0x12d   : > { %428 = vst [vmem:[%s218_s26 + $0x10] sm:$0xff] %v412_v47  ;;  %v409_v49 = vadd.f32 %v659_v43, %v408_v48 }
 0x12f   : > { %427 = vst [vmem:[%s218_s26 + $0x8] sm:$0xff] %v409_v49 }
 0x132   : > { %v413_v50 = vpop.f32.mrf.mxu1 }
 0x133   : > { %v414_v51 = vadd.f32 %v659_v43, %v413_v50 }
 0x135   : > { %429 = vst [vmem:[%s218_s26 + $0x18] sm:$0xff] %v414_v51 }
 0x140   : > { %v416_v52 = vpop.f32.mrf.mxu2 }
 0x141   : > { %v417_v53 = vadd.f32 %v659_v43, %v416_v52 }
 0x143   : > { %430 = vst [vmem:[%s218_s26 + $0x20] sm:$0xff] %v417_v53 }
 0x148   : > { %v418_v54 = vpop.f32.mrf.mxu2 }
 0x149   : > { %v419_v55 = vadd.f32 %v659_v43, %v418_v54 }
 0x14b   : > { %431 = vst [vmem:[%s218_s26 + $0x28] sm:$0xff] %v419_v55 }
 0x150   : > { %v421_v56 = vpop.f32.mrf.mxu2 }
 0x151   : > { %v422_v57 = vadd.f32 %v659_v43, %v421_v56 }
 0x153   : > { %432 = vst [vmem:[%s218_s26 + $0x30] sm:$0xff] %v422_v57 }
 0x158   : > { %v423_v58 = vpop.f32.mrf.mxu2 }
 0x159   : > { %v424_v59 = vadd.f32 %v659_v43, %v423_v58 }
 0x15b   : > { %433 = vst [vmem:[%s218_s26 + $0x38] sm:$0xff] %v424_v59 }
 0x15c   : > { %687 = shalt.err (!%p684_p3)
}
 0x15d   : > { %s724_s16 = smov 128   ;;  %s725_s25 = smov 8  }
 0x15e   : > { %617 = dma.vmem_to_hbm [thread:$0]  (%p794_p5), %s448_s9, 1024, %s450_s10, %s435_s11, %s724_s16, %s724_s16, %s725_s25  }
 0x15f PF: > { %p623_p4 = scmp.ge.s32.totalorder %s722_s21, 2  ;;  %s464_s26 = sand.u32 1, %s710_s18  }
 0x160   : > { %s465_s30 = scalar_lea.sflag [#allocation3], %s464_s26 }
 0x161   : > { %p620_p7 = pnand %p623_p4, %p798_p6 }
 0x163   : > { %p621_p8 = pneg %p620_p7 }
 0x165   : > { %705 = dma.done.wait (%p621_p8), %s465_s30, 1024  }
 0x166   : > { %707 = vsyncadd (%p621_p8), %s465_s30, 4294966272  ;;  %p15_p9 = scmp.ge.s32.totalorder %s781_s24, 6   ;;  %s892_s18 = smov %s714_s19 }
 0x167   : > { %s893_s19 = smov %s718_s20  ;;  %s894_s20 = smov %s792_s27 }
 0x168   : > { %s895_s21 = smov %s781_s24  ;;  %17 = sbr.rel (!%p15_p9) target bundleno = 3 (0x3), region = 75 }
 0x16d   :  { %471 = vsyncpa [#allocation3], 1 }
 0x16e   :  { %473 = vsyncpa [#allocation3 + $0x1], 1 }

</bundles_post_ra>
